<compile_context>
chip_gen: v6e
topology: v6e:2x2x1
jax: 0.10.0
libtpu: 0.0.40
codegen_flags: <defaults>
</compile_context>

<pallas_src>
import functools

import jax
import jax.numpy as jnp
from jax.experimental import pallas as pl
from jax.experimental.pallas import tpu as pltpu

_LANE = 128
_ROW_WIDTH = 8 * _LANE           # 1024: lane-dense last dim -> unmasked full `vst`
_TARGET_BLOCK_BYTES = 4 << 20    # ~4 MiB per block (amortizes ~0.35 us/step overhead)
_VMEM_LIMIT_BYTES = 32 << 20     # safe on v5e/v6e/v7x; 4 double-buffered 4 MiB bufs fit


def _round_up(a: int, b: int) -> int:
    return ((a + b - 1) // b) * b


def _leaky_relu_kernel(x_ref, o_ref, *, negative_slope: float):
    x = x_ref[...]
    # Exact semantics of the module's forward: torch.max(x, x * negative_slope).
    o_ref[...] = jnp.maximum(x, x * negative_slope)


def leaky_relu(x: jax.Array, negative_slope: float = 0.01) -> jax.Array:
    """Elementwise LeakyReLU via a tiled, pipelined, lane-dense Pallas kernel."""
    orig_shape = x.shape
    n = x.size
    if n == 0:
        return x

    itemsize = jnp.dtype(x.dtype).itemsize
    sublane = max(8, 32 // itemsize)          # 8 (f32) / 16 (bf16) / 32 (int8)

    # --- choose a lane-dense 2-D view; avoid pad/slice whenever possible ------
    if n % _ROW_WIDTH == 0:
        width, pad = _ROW_WIDTH, 0            # fast path: pure reshape, no HBM copies
    elif n % _LANE == 0:
        width, pad = _LANE, 0                 # still full-lane stores, still no pad
    else:
        width = _ROW_WIDTH
        pad = _round_up(n, width) - n         # minimal pad (< 1024 elements)

    rows = (n + pad) // width
    flat = x.reshape(-1)
    if pad:
        flat = jnp.pad(flat, (0, pad))
    x2d = flat.reshape(rows, width)

    # --- block sizing: ~_TARGET_BLOCK_BYTES per block, dtype-scaled -----------
    target_rows = max(
        sublane, (_TARGET_BLOCK_BYTES // (itemsize * width)) // sublane * sublane
    )
    if rows <= sublane:
        block_rows = rows                     # single full-dim block (always legal)
    else:
        # >= ~4 grid steps when possible -> pipelining + dual-TC work on v7x.
        block_rows = min(rows, target_rows,
                         _round_up(pl.cdiv(rows, 4), sublane))
    grid = (pl.cdiv(rows, block_rows),)       # ragged last block is masked by Pallas

    kernel = functools.partial(_leaky_relu_kernel, negative_slope=negative_slope)
    out2d = pl.pallas_call(
        kernel,
        out_shape=jax.ShapeDtypeStruct(x2d.shape, x2d.dtype),
        grid=grid,
        in_specs=[pl.BlockSpec((block_rows, width), lambda i: (i, 0))],
        out_specs=pl.BlockSpec((block_rows, width), lambda i: (i, 0)),
        compiler_params=pltpu.CompilerParams(
            dimension_semantics=("parallel",),
            vmem_limit_bytes=_VMEM_LIMIT_BYTES,
        ),
    )(x2d)

    # --- undo layout plumbing (slice only on the padded path) -----------------
    if pad:
        return out2d.reshape(-1)[:n].reshape(orig_shape)
    return out2d.reshape(orig_shape)


class LeakyReLU:
    """Mirror of the PyTorch module; forward runs the Pallas kernel."""

    def __init__(self, negative_slope: float = 0.01):
        self.negative_slope = negative_slope

    def __call__(self, x: jax.Array) -> jax.Array:
        return leaky_relu(x, self.negative_slope)

    def extra_repr(self) -> str:
        return f"LeakyReLU; negative slope: {self.negative_slope}"


if __name__ == "__main__":
    module = LeakyReLU(negative_slope=0.01)
    k1, k2, k3 = jax.random.split(jax.random.PRNGKey(0), 3)

    # (3, 100): the reference script's shape; exercises the minimal-pad path.
    x1 = jax.random.normal(k1, (3, 100), dtype=jnp.float32)
    o1 = jax.block_until_ready(module(x1))
    assert o1.shape == x1.shape and o1.dtype == x1.dtype
    assert jnp.array_equal(o1, jnp.maximum(x1, x1 * 0.01))

    # (64, 256): n % 1024 == 0 -> aligned no-pad path, multi-step pipelined grid.
    x2 = jax.random.normal(k2, (64, 256), dtype=jnp.float32)
    o2 = jax.block_until_ready(module(x2))
    assert o2.shape == x2.shape and o2.dtype == x2.dtype
    assert jnp.array_equal(o2, jnp.maximum(x2, x2 * 0.01))

    # (5, 100, 128) bf16: n % 128 == 0 but not % 1024 -> 128-wide no-pad path,
    # and exercises the dtype-scaled (16-row sublane) block sizing.
    x3 = jax.random.normal(k3, (5, 100, 128), dtype=jnp.bfloat16)
    o3 = jax.block_until_ready(module(x3))
    assert o3.shape == x3.shape and o3.dtype == jnp.bfloat16
    assert jnp.array_equal(o3, jnp.maximum(x3, x3 * 0.01))

    print("KERNEL_OK")
</pallas_src>

<mosaic_0001>
module attributes {stable_mosaic.version = 11 : i64} {
  func.func @_leaky_relu_kernel(%arg0: i32, %arg1: memref<1x1024xf32, #tpu.memory_space<vmem>>, %arg2: memref<1x1024xf32, #tpu.memory_space<vmem>>) attributes {dimension_semantics = [#tpu.dimension_semantics<parallel>], iteration_bounds = array<i64: 1>, scalar_prefetch = 0 : i64, scratch_operands = 0 : i64, tpu.core_type = #tpu.core_type<tc>, window_params = [{transform_indices = @transform_0, window_bounds = array<i64: 1, 1024>}, {transform_indices = @transform_1, window_bounds = array<i64: 1, 1024>}]} {
    %c0 = arith.constant 0 : index
    %c0_0 = arith.constant 0 : index
    %0 = vector.load %arg1[%c0, %c0_0] : memref<1x1024xf32, #tpu.memory_space<vmem>>, vector<1x1024xf32>
    %cst = arith.constant 0.00999999977 : f32
    %1 = vector.broadcast %cst : f32 to vector<1x1024xf32>
    %2 = arith.mulf %0, %1 : vector<1x1024xf32>
    %3 = arith.maximumf %0, %2 : vector<1x1024xf32>
    %c0_1 = arith.constant 0 : index
    %c0_2 = arith.constant 0 : index
    %4 = vector.load %arg2[%c0_1, %c0_2] : memref<1x1024xf32, #tpu.memory_space<vmem>>, vector<1x1024xf32>
    tpu.vector_store %arg2[%c0_1, %c0_2], %3 {strides = array<i32>} : memref<1x1024xf32, #tpu.memory_space<vmem>>, vector<1x1024xf32>,
    return
  }
  func.func @transform_0(%arg0: i32) -> (i32, i32) {
    %c0_i32 = arith.constant 0 : i32
    %c0_i32_0 = arith.constant 0 : i32
    return %arg0, %c0_i32 : i32, i32
  }
  func.func @transform_1(%arg0: i32) -> (i32, i32) {
    %c0_i32 = arith.constant 0 : i32
    %c0_i32_0 = arith.constant 0 : i32
    return %arg0, %c0_i32 : i32, i32
  }
}

</mosaic_0001>

<bundles_post_ra>
// kernel: tpu_custom_call.1
= control target key start
LH: loop header
LB: loop body
LE: loop exit
PB: predicated region body
PF: predicated region fallthrough
CT: control target
= control target key end

     0   :  { %6 = vsyncpa [#allocation3], 0  ;;  %s104_s0 = inlined_call_operand.hbm [shape: f32[1,1024], index: 0, kind: input, shape index: {}]   ;;  %s105_s1 = inlined_call_operand.hbm [shape: f32[1,1024], index: 1, kind: output, shape index: {}]  }
   0x1   :  { %7 = vsyncpa [#allocation4], 0  ;;  %s86_s6 = smov [#allocation2]  }
   0x2   :  { %s14_s7 = sshll.u32 %s86_s6, 4  ;;  %s15_s7 = int_to_ptr.vmem [resolvable:$true] %s14_s7 }
   0x3   :  { %s50_s8 = scalar_lea.vmem %s15_s7, 128  ;;  %p55_p1 = scmp.lt.s32.totalorder %s15_s7, %s15_s7 }
   0x4   :  { %p51_p0 = scmp.ne.s32.totalorder %s15_s7, %s50_s8  ;;  %p56_p2 = scmp.lt.s32.totalorder %s50_s8, %s50_s8 }
   0x6   :  { %p57_p3 = por %p56_p2, %p55_p1 }
   0x8   :  { %p58_p4 = pnand %p57_p3, %p51_p0 }
   0xa   :  { %61 = shalt.err (!%p58_p4)
}
   0xb   :  { %17 = dma.hbm_to_vmem [thread:$0]  %s104_s0, 128, %s15_s7, [#allocation3]  }
   0xc   :  { %82 = dma.done.wait [#allocation3], 128  }
   0xd   :  { %83 = vsyncadd [#allocation3], 4294967168  ;;  %v21_v0 = vld [vmem:[#allocation2] sm:$0xff]  ;;  %s87_s11 = smov [#allocation5]  }
   0xe   :  { %s31_s12 = sshll.u32 %s87_s11, 4  ;;  %v22_v1 = vmul.f32 0.01, %v21_v0  ;;  %s32_s12 = int_to_ptr.vmem [resolvable:$true] %s31_s12 }
   0xf   :  { %s62_s13 = scalar_lea.vmem %s32_s12, 128  ;;  %p67_p6 = scmp.lt.s32.totalorder %s32_s12, %s32_s12 }
  0x10   :  { %v23_v2 = vmax.f32 %v21_v0, %v22_v1  ;;  %p63_p5 = scmp.ne.s32.totalorder %s32_s12, %s62_s13  ;;  %p68_p7 = scmp.lt.s32.totalorder %s62_s13, %s62_s13 }
  0x12   :  { %24 = vst [vmem:[#allocation5] sm:$0xff] %v23_v2  ;;  %p69_p8 = por %p68_p7, %p67_p6 }
  0x14   :  { %p70_p9 = pnand %p69_p8, %p63_p5 }
  0x16   :  { %73 = shalt.err (!%p70_p9)
}
  0x17   :  { %34 = dma.vmem_to_hbm [thread:$0]  %s32_s12, 128, %s105_s1, [#allocation4]  }
  0x18   :  { %84 = dma.done.wait [#allocation4], 128  }
  0x19   :  { %85 = vsyncadd [#allocation4], 4294967168 }
  0x1a   :  { %38 = vsyncpa [#allocation3], 1 }
  0x1b   :  { %39 = vsyncpa [#allocation4], 1 }

</bundles_post_ra>
